<compile_context>
chip_gen: v6e
topology: v6e:2x2x1
jax: 0.10.0
libtpu: 0.0.40
codegen_flags: <defaults>
</compile_context>

<pallas_src>
import math
import jax
import jax.numpy as jnp
from jax.experimental import pallas as pl
from jax.experimental.pallas import tpu as pltpu


def _round_up(x, m):
    return (x + m - 1) // m * m


def _vmem_bytes(B_pad, K_pad, tn, wbytes):
    """Double-buffered VMEM footprint of all pipelined blocks for one tile size."""
    f32b = 4
    xh = 2 * B_pad * K_pad * f32b          # fused [h|x] activations (resident)
    hv = 2 * B_pad * tn * f32b             # previous-h tile view of xh
    cc = 2 * B_pad * tn * f32b             # c tile
    uu = 2 * B_pad * 128 * f32b            # u (lane-padded)
    ww = 2 * K_pad * 4 * tn * wbytes       # fused weight tile (bf16 or f32)
    bb = 2 * 8 * 4 * tn * f32b             # bias tile (sublane-padded)
    oo = 2 * 2 * B_pad * tn * f32b         # h_out, c_out tiles
    return xh + hv + cc + uu + ww + bb + oo


def _pick_tn(B_pad, K_pad, H_pad, wbytes, budget=40 * 1024 * 1024):
    """Largest lane-dense hidden tile that divides H_pad and fits the budget."""
    cands = [t for t in (512, 256, 128) if H_pad % t == 0]
    if H_pad >= 256:
        # Keep >= 2 grid steps so v7x's 2 TensorCores both get work
        # (harmless on v5e/v6e).
        smaller = [t for t in cands if t < H_pad]
        if smaller:
            cands = smaller
    for t in cands:
        if _vmem_bytes(B_pad, K_pad, t, wbytes) <= budget:
            return t
    return cands[-1]


def lstm_cell_kernel(xh_ref, hprev_ref, c_ref, u_ref, w_ref, b_ref,
                     h_out_ref, c_out_ref):
    tn = h_out_ref.shape[-1]
    # Single fused MXU matmul for this hidden tile: (B, K_pad) @ (K_pad, 4*tn).
    # LHS is cast to the (possibly bf16) weight dtype; accumulate in f32.
    A = jnp.dot(xh_ref[...].astype(w_ref.dtype), w_ref[...],
                preferred_element_type=jnp.float32)
    A = A + b_ref[...]                                 # bias stays f32 (exact)
    # Lane-dense gate slices (tn is a multiple of 128): [i | f | g | o].
    i_t = jax.nn.sigmoid(A[:, :tn])
    f_t = jax.nn.sigmoid(A[:, tn:2 * tn])
    g_t = jnp.tanh(A[:, 2 * tn:3 * tn])
    o_t = jax.nn.sigmoid(A[:, 3 * tn:])
    h_prev = hprev_ref[...]                            # f32 view of xh h-region
    c_new = f_t * c_ref[...] + i_t * g_t
    u = u_ref[...]                                     # (B, 1) lane-broadcast
    # u*(o*tanh(c)) + (1-u)*h  ==  h + u*(o*tanh(c) - h)
    h_new = h_prev + u * (o_t * jnp.tanh(c_new) - h_prev)
    h_out_ref[...] = h_new.astype(h_out_ref.dtype)
    c_out_ref[...] = c_new.astype(c_out_ref.dtype)


def lstm_cell(x_t, h_t, c_t, u, U, V, bias, *, weight_dtype=jnp.bfloat16):
    B, D_in = x_t.shape
    H = h_t.shape[-1]
    f32 = jnp.float32
    wbytes = jnp.dtype(weight_dtype).itemsize

    B_pad = _round_up(B, 8)                    # sublane-aligned batch
    H_pad = _round_up(H, 128)                  # lane-dense hidden dim
    K_pad = _round_up(H_pad + D_in, 128)       # full-vreg contraction dim
    tn = _pick_tn(B_pad, K_pad, H_pad, wbytes)
    n_tiles = H_pad // tn

    # --- fused / padded activations:  xh = [h (padded to H_pad) | x | 0] -----
    h_pad = jnp.pad(h_t.astype(f32), ((0, B_pad - B), (0, H_pad - H)))
    x_pad = jnp.pad(x_t.astype(f32), ((0, B_pad - B), (0, 0)))
    xh = jnp.concatenate([h_pad, x_pad], axis=1)
    xh = jnp.pad(xh, ((0, 0), (0, K_pad - xh.shape[1])))          # (B_pad, K_pad)
    c_p = jnp.pad(c_t.astype(f32), ((0, B_pad - B), (0, H_pad - H)))
    u_p = jnp.pad(u.astype(f32), ((0, B_pad - B), (0, 0)))

    # --- fused, padded, tile-reordered weights --------------------------------
    # Row layout matches xh: [V (H rows, padded to H_pad) ; U (D_in rows) ; 0].
    # Column layout: gate order [i|f|g|o]; pad each gate to H_pad, regroup so
    # tile j holds [i_j | f_j | g_j | o_j] (4*tn lanes, all 128-aligned).
    Wv = jnp.pad(V.astype(f32), ((0, H_pad - H), (0, 0)))
    W = jnp.concatenate([Wv, U.astype(f32)], axis=0)
    W = jnp.pad(W, ((0, K_pad - W.shape[0]), (0, 0)))             # (K_pad, 4H)
    W4 = jnp.pad(W.reshape(K_pad, 4, H), ((0, 0), (0, 0), (0, H_pad - H)))
    W_re = (W4.reshape(K_pad, 4, n_tiles, tn)
              .transpose(0, 2, 1, 3)
              .reshape(K_pad, n_tiles * 4 * tn)
              .astype(weight_dtype))                              # bf16 stream
    b4 = jnp.pad(bias.astype(f32).reshape(4, H), ((0, 0), (0, H_pad - H)))
    b_re = (b4.reshape(4, n_tiles, tn)
              .transpose(1, 0, 2)
              .reshape(1, n_tiles * 4 * tn))                      # bias stays f32

    vmem_need = _vmem_bytes(B_pad, K_pad, tn, wbytes)
    vmem_limit = min(48 * 1024 * 1024,
                     max(32 * 1024 * 1024, vmem_need + 4 * 1024 * 1024))

    cost = pl.CostEstimate(
        flops=2 * B_pad * K_pad * 4 * H_pad + 10 * B_pad * H_pad,
        transcendentals=5 * B_pad * H_pad,
        bytes_accessed=(4 * B_pad * K_pad                 # xh
                        + 4 * B_pad * H_pad               # h view
                        + 4 * B_pad * H_pad               # c
                        + 4 * B_pad                       # u
                        + wbytes * K_pad * 4 * H_pad      # W (bf16/f32)
                        + 4 * 4 * H_pad                   # bias
                        + 2 * 4 * B_pad * H_pad),         # outputs
    )

    h_new_p, c_new_p = pl.pallas_call(
        lstm_cell_kernel,
        out_shape=(jax.ShapeDtypeStruct((B_pad, H_pad), f32),
                   jax.ShapeDtypeStruct((B_pad, H_pad), f32)),
        grid=(n_tiles,),
        in_specs=[
            pl.BlockSpec((B_pad, K_pad), lambda j: (0, 0)),   # xh (resident)
            pl.BlockSpec((B_pad, tn), lambda j: (0, j)),      # h_prev view of xh
            pl.BlockSpec((B_pad, tn), lambda j: (0, j)),      # c tile
            pl.BlockSpec((B_pad, 1), lambda j: (0, 0)),       # u (skip gate)
            pl.BlockSpec((K_pad, 4 * tn), lambda j: (0, j)),  # fused W tile
            pl.BlockSpec((1, 4 * tn), lambda j: (0, j)),      # bias tile
        ],
        out_specs=(pl.BlockSpec((B_pad, tn), lambda j: (0, j)),
                   pl.BlockSpec((B_pad, tn), lambda j: (0, j))),
        compiler_params=pltpu.CompilerParams(
            # Hidden tiles are independent -> shard across v7x's 2 TCs;
            # harmless no-op on v5e/v6e.
            dimension_semantics=("parallel",),
            vmem_limit_bytes=vmem_limit,
        ),
        cost_estimate=cost,
    )(xh, xh, c_p, u_p, W_re, b_re)   # xh passed twice: full + tiled h view

    return h_new_p[:B, :H], c_new_p[:B, :H]


def lstm_cell_ref(x_t, h_t, c_t, u, U, V, bias):
    H = h_t.shape[-1]
    A = x_t @ U + h_t @ V + bias
    i_t = jax.nn.sigmoid(A[:, :H])
    f_t = jax.nn.sigmoid(A[:, H:2 * H])
    g_t = jnp.tanh(A[:, 2 * H:3 * H])
    o_t = jax.nn.sigmoid(A[:, 3 * H:])
    c_new = f_t * c_t + i_t * g_t
    h_new = u * (o_t * jnp.tanh(c_new)) + (1.0 - u) * h_t
    return h_new, c_new


if __name__ == "__main__":
    B, D_IN, H = 8, 32, 32
    key = jax.random.PRNGKey(0)
    k_U, k_V, k_b, k_x, k_h, k_c, k_u = jax.random.split(key, 7)

    # Deterministic parameter init matching nn.Module: uniform(-stdv, stdv),
    # stdv = 1/sqrt(H).
    stdv = 1.0 / math.sqrt(H)
    U = jax.random.uniform(k_U, (D_IN, 4 * H), jnp.float32, -stdv, stdv)
    V = jax.random.uniform(k_V, (H, 4 * H), jnp.float32, -stdv, stdv)
    bias = jax.random.uniform(k_b, (4 * H,), jnp.float32, -stdv, stdv)

    x_t = jax.random.normal(k_x, (B, D_IN), jnp.float32)
    h_t = jax.random.normal(k_h, (B, H), jnp.float32)
    c_t = jax.random.normal(k_c, (B, H), jnp.float32)
    u = jax.random.uniform(k_u, (B, 1), jnp.float32)   # skip/update gate [0,1)

    h_ref, c_ref = lstm_cell_ref(x_t, h_t, c_t, u, U, V, bias)
    run = jax.jit(lstm_cell, static_argnames=("weight_dtype",))

    # f32-weight path: must match the reference tightly.
    h32, c32 = run(x_t, h_t, c_t, u, U, V, bias, weight_dtype=jnp.float32)
    jax.block_until_ready((h32, c32))
    assert jnp.allclose(h32, h_ref, atol=1e-5, rtol=1e-5)
    assert jnp.allclose(c32, c_ref, atol=1e-5, rtol=1e-5)

    # bf16 weight-streaming path (default / perf mode): bf16 MXU inputs with
    # f32 accumulation -> looser tolerance vs the f32 reference.
    hbf, cbf = run(x_t, h_t, c_t, u, U, V, bias, weight_dtype=jnp.bfloat16)
    jax.block_until_ready((hbf, cbf))
    assert jnp.allclose(hbf, h_ref, atol=3e-2, rtol=3e-2)
    assert jnp.allclose(cbf, c_ref, atol=3e-2, rtol=3e-2)

    print("KERNEL_OK")
</pallas_src>

<mosaic_0001>
module attributes {stable_mosaic.version = 11 : i64} {
  func.func @lstm_cell_kernel(%arg0: i32, %arg1: memref<8x256xf32, #tpu.memory_space<vmem>>, %arg2: memref<8x128xf32, #tpu.memory_space<vmem>>, %arg3: memref<8x128xf32, #tpu.memory_space<vmem>>, %arg4: memref<8x1xf32, #tpu.memory_space<vmem>>, %arg5: memref<256x512xf32, #tpu.memory_space<vmem>>, %arg6: memref<1x512xf32, #tpu.memory_space<vmem>>, %arg7: memref<8x128xf32, #tpu.memory_space<vmem>>, %arg8: memref<8x128xf32, #tpu.memory_space<vmem>>) attributes {dimension_semantics = [#tpu.dimension_semantics<parallel>], iteration_bounds = array<i64: 1>, scalar_prefetch = 0 : i64, scratch_operands = 0 : i64, tpu.core_type = #tpu.core_type<tc>, window_params = [{pipeline_mode = #tpu.pipeline_mode<synchronous>, transform_indices = @transform_0, window_bounds = array<i64: 8, 256>}, {transform_indices = @transform_1, window_bounds = array<i64: 8, 128>}, {transform_indices = @transform_2, window_bounds = array<i64: 8, 128>}, {pipeline_mode = #tpu.pipeline_mode<synchronous>, transform_indices = @transform_3, window_bounds = array<i64: 8, 1>}, {transform_indices = @transform_4, window_bounds = array<i64: 256, 512>}, {transform_indices = @transform_5, window_bounds = array<i64: 1, 512>}, {transform_indices = @transform_6, window_bounds = array<i64: 8, 128>}, {transform_indices = @transform_7, window_bounds = array<i64: 8, 128>}]} {
    %c0 = arith.constant 0 : index
    %c0_0 = arith.constant 0 : index
    %0 = vector.load %arg1[%c0, %c0_0] : memref<8x256xf32, #tpu.memory_space<vmem>>, vector<8x256xf32>
    %c0_1 = arith.constant 0 : index
    %c0_2 = arith.constant 0 : index
    %1 = vector.load %arg5[%c0_1, %c0_2] : memref<256x512xf32, #tpu.memory_space<vmem>>, vector<256x512xf32>
    %cst = arith.constant dense<0.000000e+00> : vector<8x512xf32>
    %2 = tpu.matmul %0, %1, %cst {dimension_numbers = #tpu.dot_dimension_numbers<[1], [0], [0], [1], [0, 0, 1, 1], [], []>} : vector<8x256xf32>, vector<256x512xf32>, vector<8x512xf32> -> vector<8x512xf32>
    %c0_3 = arith.constant 0 : index
    %c0_4 = arith.constant 0 : index
    %3 = vector.load %arg6[%c0_3, %c0_4] : memref<1x512xf32, #tpu.memory_space<vmem>>, vector<1x512xf32>
    %4 = vector.broadcast %3 : vector<1x512xf32> to vector<8x512xf32>
    %5 = arith.addf %2, %4 : vector<8x512xf32>
    %6 = vector.extract_strided_slice %5 {offsets = [0, 0], sizes = [8, 128], strides = [1, 1]} : vector<8x512xf32> to vector<8x128xf32>
    %7 = arith.negf %6 : vector<8x128xf32>
    %8 = math.exp %7 : vector<8x128xf32>
    %cst_5 = arith.constant 1.000000e+00 : f32
    %9 = vector.broadcast %cst_5 : f32 to vector<8x128xf32>
    %10 = arith.addf %9, %8 : vector<8x128xf32>
    %11 = arith.divf %9, %10 : vector<8x128xf32>
    %12 = vector.extract_strided_slice %5 {offsets = [0, 128], sizes = [8, 128], strides = [1, 1]} : vector<8x512xf32> to vector<8x128xf32>
    %13 = arith.negf %12 : vector<8x128xf32>
    %14 = math.exp %13 : vector<8x128xf32>
    %cst_6 = arith.constant 1.000000e+00 : f32
    %15 = vector.broadcast %cst_6 : f32 to vector<8x128xf32>
    %16 = arith.addf %15, %14 : vector<8x128xf32>
    %17 = arith.divf %15, %16 : vector<8x128xf32>
    %18 = vector.extract_strided_slice %5 {offsets = [0, 256], sizes = [8, 128], strides = [1, 1]} : vector<8x512xf32> to vector<8x128xf32>
    %19 = math.tanh %18 : vector<8x128xf32>
    %20 = vector.extract_strided_slice %5 {offsets = [0, 384], sizes = [8, 128], strides = [1, 1]} : vector<8x512xf32> to vector<8x128xf32>
    %21 = arith.negf %20 : vector<8x128xf32>
    %22 = math.exp %21 : vector<8x128xf32>
    %cst_7 = arith.constant 1.000000e+00 : f32
    %23 = vector.broadcast %cst_7 : f32 to vector<8x128xf32>
    %24 = arith.addf %23, %22 : vector<8x128xf32>
    %25 = arith.divf %23, %24 : vector<8x128xf32>
    %c0_8 = arith.constant 0 : index
    %c0_9 = arith.constant 0 : index
    %26 = vector.load %arg2[%c0_8, %c0_9] : memref<8x128xf32, #tpu.memory_space<vmem>>, vector<8x128xf32>
    %c0_10 = arith.constant 0 : index
    %c0_11 = arith.constant 0 : index
    %27 = vector.load %arg3[%c0_10, %c0_11] : memref<8x128xf32, #tpu.memory_space<vmem>>, vector<8x128xf32>
    %28 = arith.mulf %17, %27 : vector<8x128xf32>
    %29 = arith.mulf %11, %19 : vector<8x128xf32>
    %30 = arith.addf %28, %29 : vector<8x128xf32>
    %c0_12 = arith.constant 0 : index
    %c0_13 = arith.constant 0 : index
    %31 = vector.load %arg4[%c0_12, %c0_13] : memref<8x1xf32, #tpu.memory_space<vmem>>, vector<8x1xf32>
    %32 = math.tanh %30 : vector<8x128xf32>
    %33 = arith.mulf %25, %32 : vector<8x128xf32>
    %34 = arith.subf %33, %26 : vector<8x128xf32>
    %35 = vector.broadcast %31 : vector<8x1xf32> to vector<8x128xf32>
    %36 = arith.mulf %35, %34 : vector<8x128xf32>
    %37 = arith.addf %26, %36 : vector<8x128xf32>
    %c0_14 = arith.constant 0 : index
    %c0_15 = arith.constant 0 : index
    %38 = vector.load %arg7[%c0_14, %c0_15] : memref<8x128xf32, #tpu.memory_space<vmem>>, vector<8x128xf32>
    tpu.vector_store %arg7[%c0_14, %c0_15], %37 {strides = array<i32>} : memref<8x128xf32, #tpu.memory_space<vmem>>, vector<8x128xf32>,
    %c0_16 = arith.constant 0 : index
    %c0_17 = arith.constant 0 : index
    %39 = vector.load %arg8[%c0_16, %c0_17] : memref<8x128xf32, #tpu.memory_space<vmem>>, vector<8x128xf32>
    tpu.vector_store %arg8[%c0_16, %c0_17], %30 {strides = array<i32>} : memref<8x128xf32, #tpu.memory_space<vmem>>, vector<8x128xf32>,
    return
  }
  func.func @transform_0(%arg0: i32) -> (i32, i32) {
    %c0_i32 = arith.constant 0 : i32
    %c0_i32_0 = arith.constant 0 : i32
    %c0_i32_1 = arith.constant 0 : i32
    return %c0_i32, %c0_i32_0 : i32, i32
  }
  func.func @transform_1(%arg0: i32) -> (i32, i32) {
    %c0_i32 = arith.constant 0 : i32
    %c0_i32_0 = arith.constant 0 : i32
    return %c0_i32, %arg0 : i32, i32
  }
  func.func @transform_2(%arg0: i32) -> (i32, i32) {
    %c0_i32 = arith.constant 0 : i32
    %c0_i32_0 = arith.constant 0 : i32
    return %c0_i32, %arg0 : i32, i32
  }
  func.func @transform_3(%arg0: i32) -> (i32, i32) {
    %c0_i32 = arith.constant 0 : i32
    %c0_i32_0 = arith.constant 0 : i32
    %c0_i32_1 = arith.constant 0 : i32
    return %c0_i32, %c0_i32_0 : i32, i32
  }
  func.func @transform_4(%arg0: i32) -> (i32, i32) {
    %c0_i32 = arith.constant 0 : i32
    %c0_i32_0 = arith.constant 0 : i32
    return %c0_i32, %arg0 : i32, i32
  }
  func.func @transform_5(%arg0: i32) -> (i32, i32) {
    %c0_i32 = arith.constant 0 : i32
    %c0_i32_0 = arith.constant 0 : i32
    return %c0_i32, %arg0 : i32, i32
  }
  func.func @transform_6(%arg0: i32) -> (i32, i32) {
    %c0_i32 = arith.constant 0 : i32
    %c0_i32_0 = arith.constant 0 : i32
    return %c0_i32, %arg0 : i32, i32
  }
  func.func @transform_7(%arg0: i32) -> (i32, i32) {
    %c0_i32 = arith.constant 0 : i32
    %c0_i32_0 = arith.constant 0 : i32
    return %c0_i32, %arg0 : i32, i32
  }
}

</mosaic_0001>

<bundles_post_ra>
// kernel: lstm_cell.1
= control target key start
LH: loop header
LB: loop body
LE: loop exit
PB: predicated region body
PF: predicated region fallthrough
CT: control target
= control target key end

     0   :  { %13 = vsyncpa [#allocation3], 0  ;;  %v453_v4 = vmov 0   ;;  %s904_s0 = inlined_call_operand.vmem [shape: f32[8,256], index: 0, kind: input, shape index: {}, may-alias: {0,1}]   ;;  %s905_s1 = inlined_call_operand.vmem [shape: f32[8,256], index: 1, kind: input, shape index: {}, may-alias: {0,1}]   ;;  %s906_s2 = inlined_call_operand.vmem [shape: f32[8,128], index: 2, kind: input, shape index: {}]   ;;  %s907_s3 = inlined_call_operand.vmem [shape: f32[8,1], index: 3, kind: input, shape index: {}]   ;;  %s908_s4 = inlined_call_operand.vmem [shape: f32[256,512], index: 4, kind: input, shape index: {}]   ;;  %s909_s5 = inlined_call_operand.vmem [shape: f32[1,512], index: 5, kind: input, shape index: {}]   ;;  %s910_s6 = inlined_call_operand.hbm [shape: f32[8,128], index: 6, kind: output, shape index: {0}]   ;;  %s911_s7 = inlined_call_operand.hbm [shape: f32[8,128], index: 7, kind: output, shape index: {1}]  }
   0x1   :  { %v90_v0 = vld [vmem:[%s908_s4 + $0x1e8] sm:$0xff]  ;;  %v89_v1 = vld [vmem:[%s908_s4 + $0x1e0] sm:$0xff]  ;;  %392 = vset.pattern.permute.xlu0 %v453_v4  ;;  %v92_v9 = vld [vmem:[%s908_s4 + $0x1f8] sm:$0xff] }
   0x2   :  { %v86_v2 = vld [vmem:[%s908_s4 + $0x1c8] sm:$0xff]  ;;  %179 = vmatprep.subr.mxu0 %v90_v0  ;;  %v85_v3 = vld [vmem:[%s908_s4 + $0x1c0] sm:$0xff]  ;;  %250 = vmatprep.subr.mxu1 %v92_v9  ;;  %v91_v11 = vld [vmem:[%s908_s4 + $0x1f0] sm:$0xff] }
   0x3   :  { %180 = vmatpush1.msra.mxu0 %v89_v1  ;;  %v82_v5 = vld [vmem:[%s908_s4 + $0x1a8] sm:$0xff]  ;;  %v81_v6 = vld [vmem:[%s908_s4 + $0x1a0] sm:$0xff]  ;;  %251 = vmatpush1.msra.mxu1 %v91_v11  ;;  %v88_v13 = vld [vmem:[%s908_s4 + $0x1d8] sm:$0xff] }
   0x4   :  { %181 = vmatprep.subr.mxu0 %v86_v2  ;;  %v78_v7 = vld [vmem:[%s908_s4 + $0x188] sm:$0xff]  ;;  %v77_v8 = vld [vmem:[%s908_s4 + $0x180] sm:$0xff]  ;;  %v87_v14 = vld [vmem:[%s908_s4 + $0x1d0] sm:$0xff]  ;;  %252 = vmatprep.subr.mxu1 %v88_v13 }
   0x5   :  { %182 = vmatpush1.msra.mxu0 %v85_v3  ;;  %v74_v10 = vld [vmem:[%s908_s4 + $0x168] sm:$0xff]  ;;  %v73_v12 = vld [vmem:[%s908_s4 + $0x160] sm:$0xff]  ;;  %v84_v16 = vld [vmem:[%s908_s4 + $0x1b8] sm:$0xff]  ;;  %253 = vmatpush1.msra.mxu1 %v87_v14 }
   0x6   :  { %183 = vmatprep.subr.mxu0 %v82_v5  ;;  %v70_v15 = vld [vmem:[%s908_s4 + $0x148] sm:$0xff]  ;;  %v69_v17 = vld [vmem:[%s908_s4 + $0x140] sm:$0xff]  ;;  %v83_v18 = vld [vmem:[%s908_s4 + $0x1b0] sm:$0xff]  ;;  %254 = vmatprep.subr.mxu1 %v84_v16 }
   0x7   :  { %184 = vmatpush1.msra.mxu0 %v81_v6  ;;  %v80_v19 = vld [vmem:[%s908_s4 + $0x198] sm:$0xff]  ;;  %v66_v20 = vld [vmem:[%s908_s4 + $0x128] sm:$0xff]  ;;  %v79_v21 = vld [vmem:[%s908_s4 + $0x190] sm:$0xff]  ;;  %255 = vmatpush1.msra.mxu1 %v83_v18 }
   0x8   :  { %185 = vmatprep.subr.mxu0 %v78_v7  ;;  %v65_v22 = vld [vmem:[%s908_s4 + $0x120] sm:$0xff]  ;;  %v76_v23 = vld [vmem:[%s908_s4 + $0x178] sm:$0xff]  ;;  %v62_v24 = vld [vmem:[%s908_s4 + $0x108] sm:$0xff]  ;;  %256 = vmatprep.subr.mxu1 %v80_v19 }
   0x9   :  { %186 = vmatpush1.msra.mxu0 %v77_v8  ;;  %v75_v25 = vld [vmem:[%s908_s4 + $0x170] sm:$0xff]  ;;  %v61_v26 = vld [vmem:[%s908_s4 + $0x100] sm:$0xff]  ;;  %257 = vmatpush1.msra.mxu1 %v79_v21  ;;  %v72_v27 = vld [vmem:[%s908_s4 + $0x158] sm:$0xff] }
   0xa   :  { %187 = vmatprep.subr.mxu0 %v74_v10  ;;  %v58_v28 = vld [vmem:[%s908_s4 + $0xe8] sm:$0xff]  ;;  %258 = vmatprep.subr.mxu1 %v76_v23  ;;  %v71_v29 = vld [vmem:[%s908_s4 + $0x150] sm:$0xff]  ;;  %v57_v30 = vld [vmem:[%s908_s4 + $0xe0] sm:$0xff] }
   0xb   :  { %188 = vmatpush1.msra.mxu0 %v73_v12  ;;  %259 = vmatpush1.msra.mxu1 %v75_v25  ;;  %v68_v31 = vld [vmem:[%s908_s4 + $0x138] sm:$0xff]  ;;  %v54_v32 = vld [vmem:[%s908_s4 + $0xc8] sm:$0xff]  ;;  %v67_v33 = vld [vmem:[%s908_s4 + $0x130] sm:$0xff] }
   0xc   :  { %189 = vmatprep.subr.mxu0 %v70_v15  ;;  %260 = vmatprep.subr.mxu1 %v72_v27  ;;  %v53_v34 = vld [vmem:[%s908_s4 + $0xc0] sm:$0xff]  ;;  %v64_v35 = vld [vmem:[%s908_s4 + $0x118] sm:$0xff]  ;;  %v50_v36 = vld [vmem:[%s908_s4 + $0xa8] sm:$0xff] }
   0xd   :  { %190 = vmatpush1.msra.mxu0 %v69_v17  ;;  %261 = vmatpush1.msra.mxu1 %v71_v29  ;;  %v63_v37 = vld [vmem:[%s908_s4 + $0x110] sm:$0xff]  ;;  %v49_v38 = vld [vmem:[%s908_s4 + $0xa0] sm:$0xff]  ;;  %v60_v39 = vld [vmem:[%s908_s4 + $0xf8] sm:$0xff] }
   0xe   :  { %191 = vmatprep.subr.mxu0 %v66_v20  ;;  %262 = vmatprep.subr.mxu1 %v68_v31  ;;  %v46_v40 = vld [vmem:[%s908_s4 + $0x88] sm:$0xff]  ;;  %v59_v41 = vld [vmem:[%s908_s4 + $0xf0] sm:$0xff]  ;;  %v45_v42 = vld [vmem:[%s908_s4 + $0x80] sm:$0xff] }
   0xf   :  { %192 = vmatpush1.msra.mxu0 %v65_v22  ;;  %263 = vmatpush1.msra.mxu1 %v67_v33  ;;  %v56_v43 = vld [vmem:[%s908_s4 + $0xd8] sm:$0xff]  ;;  %v42_v44 = vld [vmem:[%s908_s4 + $0x68] sm:$0xff]  ;;  %v55_v45 = vld [vmem:[%s908_s4 + $0xd0] sm:$0xff] }
  0x10   :  { %193 = vmatprep.subr.mxu0 %v62_v24  ;;  %264 = vmatprep.subr.mxu1 %v64_v35  ;;  %v41_v46 = vld [vmem:[%s908_s4 + $0x60] sm:$0xff]  ;;  %v52_v47 = vld [vmem:[%s908_s4 + $0xb8] sm:$0xff]  ;;  %v38_v48 = vld [vmem:[%s908_s4 + $0x48] sm:$0xff] }
  0x11   :  { %194 = vmatpush1.msra.mxu0 %v61_v26  ;;  %265 = vmatpush1.msra.mxu1 %v63_v37  ;;  %v51_v49 = vld [vmem:[%s908_s4 + $0xb0] sm:$0xff]  ;;  %v37_v50 = vld [vmem:[%s908_s4 + $0x40] sm:$0xff]  ;;  %v48_v51 = vld [vmem:[%s908_s4 + $0x98] sm:$0xff] }
  0x12   :  { %195 = vmatprep.subr.mxu0 %v58_v28  ;;  %266 = vmatprep.subr.mxu1 %v60_v39  ;;  %v34_v52 = vld [vmem:[%s908_s4 + $0x28] sm:$0xff]  ;;  %v47_v53 = vld [vmem:[%s908_s4 + $0x90] sm:$0xff]  ;;  %v33_v54 = vld [vmem:[%s908_s4 + $0x20] sm:$0xff] }
  0x13   :  { %196 = vmatpush1.msra.mxu0 %v57_v30  ;;  %267 = vmatpush1.msra.mxu1 %v59_v41  ;;  %v44_v55 = vld [vmem:[%s908_s4 + $0x78] sm:$0xff]  ;;  %v30_v56 = vld [vmem:[%s908_s4 + $0x8] sm:$0xff]  ;;  %v43_v57 = vld [vmem:[%s908_s4 + $0x70] sm:$0xff] }
  0x14   :  { %197 = vmatprep.subr.mxu0 %v54_v32  ;;  %268 = vmatprep.subr.mxu1 %v56_v43  ;;  %v29_v58 = vld [vmem:[%s908_s4] sm:$0xff]  ;;  %v40_v59 = vld [vmem:[%s908_s4 + $0x58] sm:$0xff]  ;;  %v154_v60 = vld [vmem:[%s908_s4 + $0x3e8] sm:$0xff] }
  0x15   :  { %198 = vmatpush1.msra.mxu0 %v53_v34  ;;  %269 = vmatpush1.msra.mxu1 %v55_v45  ;;  %v39_v61 = vld [vmem:[%s908_s4 + $0x50] sm:$0xff]  ;;  %v153_v62 = vld [vmem:[%s908_s4 + $0x3e0] sm:$0xff]  ;;  %v36_v63 = vld [vmem:[%s908_s4 + $0x38] sm:$0xff] }
  0x16   :  { %199 = vmatprep.subr.mxu0 %v50_v36  ;;  %270 = vmatprep.subr.mxu1 %v52_v47  ;;  %v150_v0 = vld [vmem:[%s908_s4 + $0x3c8] sm:$0xff]  ;;  %v35_v1 = vld [vmem:[%s908_s4 + $0x30] sm:$0xff]  ;;  %v149_v2 = vld [vmem:[%s908_s4 + $0x3c0] sm:$0xff] }
  0x17   :  { %200 = vmatpush1.msra.mxu0 %v49_v38  ;;  %271 = vmatpush1.msra.mxu1 %v51_v49  ;;  %v32_v3 = vld [vmem:[%s908_s4 + $0x18] sm:$0xff]  ;;  %v146_v4 = vld [vmem:[%s908_s4 + $0x3a8] sm:$0xff]  ;;  %v31_v5 = vld [vmem:[%s908_s4 + $0x10] sm:$0xff] }
  0x18   :  { %201 = vmatprep.subr.mxu0 %v46_v40  ;;  %272 = vmatprep.subr.mxu1 %v48_v51  ;;  %v145_v6 = vld [vmem:[%s908_s4 + $0x3a0] sm:$0xff]  ;;  %v156_v7 = vld [vmem:[%s908_s4 + $0x3f8] sm:$0xff]  ;;  %v142_v8 = vld [vmem:[%s908_s4 + $0x388] sm:$0xff] }
  0x19   :  { %202 = vmatpush1.msra.mxu0 %v45_v42  ;;  %273 = vmatpush1.msra.mxu1 %v47_v53  ;;  %v155_v9 = vld [vmem:[%s908_s4 + $0x3f0] sm:$0xff]  ;;  %v141_v10 = vld [vmem:[%s908_s4 + $0x380] sm:$0xff]  ;;  %v152_v11 = vld [vmem:[%s908_s4 + $0x3d8] sm:$0xff] }
  0x1a   :  { %203 = vmatprep.subr.mxu0 %v42_v44  ;;  %274 = vmatprep.subr.mxu1 %v44_v55  ;;  %v138_v12 = vld [vmem:[%s908_s4 + $0x368] sm:$0xff]  ;;  %v151_v13 = vld [vmem:[%s908_s4 + $0x3d0] sm:$0xff]  ;;  %v137_v14 = vld [vmem:[%s908_s4 + $0x360] sm:$0xff] }
  0x1b   :  { %204 = vmatpush1.msra.mxu0 %v41_v46  ;;  %275 = vmatpush1.msra.mxu1 %v43_v57  ;;  %v148_v15 = vld [vmem:[%s908_s4 + $0x3b8] sm:$0xff]  ;;  %v134_v16 = vld [vmem:[%s908_s4 + $0x348] sm:$0xff]  ;;  %v147_v17 = vld [vmem:[%s908_s4 + $0x3b0] sm:$0xff] }
  0x1c   :  { %205 = vmatprep.subr.mxu0 %v38_v48  ;;  %276 = vmatprep.subr.mxu1 %v40_v59  ;;  %v133_v18 = vld [vmem:[%s908_s4 + $0x340] sm:$0xff]  ;;  %v144_v19 = vld [vmem:[%s908_s4 + $0x398] sm:$0xff]  ;;  %v130_v20 = vld [vmem:[%s908_s4 + $0x328] sm:$0xff] }
  0x1d   :  { %206 = vmatpush1.msra.mxu0 %v37_v50  ;;  %277 = vmatpush1.msra.mxu1 %v39_v61  ;;  %v143_v21 = vld [vmem:[%s908_s4 + $0x390] sm:$0xff]  ;;  %v129_v22 = vld [vmem:[%s908_s4 + $0x320] sm:$0xff]  ;;  %v140_v23 = vld [vmem:[%s908_s4 + $0x378] sm:$0xff] }
  0x1e   :  { %207 = vmatprep.subr.mxu0 %v34_v52  ;;  %278 = vmatprep.subr.mxu1 %v36_v63  ;;  %v126_v24 = vld [vmem:[%s908_s4 + $0x308] sm:$0xff]  ;;  %v139_v25 = vld [vmem:[%s908_s4 + $0x370] sm:$0xff] }
  0x1f   :  { %208 = vmatpush1.msra.mxu0 %v33_v54  ;;  %279 = vmatpush1.msra.mxu1 %v35_v1 }
  0x20   :  { %209 = vmatprep.subr.mxu0 %v30_v56  ;;  %280 = vmatprep.subr.mxu1 %v32_v3 }
  0x21   :  { %210 = vmatpush1.msra.mxu0 %v29_v58  ;;  %281 = vmatpush1.msra.mxu1 %v31_v5 }
  0x22   :  { %211 = vmatprep.subr.mxu0 %v154_v60  ;;  %282 = vmatprep.subr.mxu1 %v156_v7 }
  0x23   :  { %212 = vmatpush2.msra.mxu0 %v153_v62  ;;  %283 = vmatpush2.msra.mxu1 %v155_v9 }
  0x24   :  { %213 = vmatprep.subr.mxu0 %v150_v0  ;;  %284 = vmatprep.subr.mxu1 %v152_v11 }
  0x25   :  { %214 = vmatpush2.msra.mxu0 %v149_v2  ;;  %285 = vmatpush2.msra.mxu1 %v151_v13 }
  0x26   :  { %215 = vmatprep.subr.mxu0 %v146_v4  ;;  %286 = vmatprep.subr.mxu1 %v148_v15 }
  0x27   :  { %216 = vmatpush2.msra.mxu0 %v145_v6  ;;  %287 = vmatpush2.msra.mxu1 %v147_v17 }
  0x28   :  { %217 = vmatprep.subr.mxu0 %v142_v8  ;;  %288 = vmatprep.subr.mxu1 %v144_v19 }
  0x29   :  { %218 = vmatpush2.msra.mxu0 %v141_v10 }
  0x2a   :  { %219 = vmatprep.subr.mxu0 %v138_v12 }
  0x2b   :  { %220 = vmatpush2.msra.mxu0 %v137_v14 }
  0x2c   :  { %221 = vmatprep.subr.mxu0 %v134_v16 }
  0x2d   :  { %222 = vmatpush2.msra.mxu0 %v133_v18 }
  0x2e   :  { %14 = vsyncpa [#allocation5], 0  ;;  %223 = vmatprep.subr.mxu0 %v130_v20  ;;  %v125_v26 = vld [vmem:[%s908_s4 + $0x300] sm:$0xff]  ;;  %289 = vmatpush2.msra.mxu1 %v143_v21  ;;  %v136_v27 = vld [vmem:[%s908_s4 + $0x358] sm:$0xff]  ;;  %v159_v4 = vlaneseq  ;;  %s454_s10 = smov [#allocation4]  }
  0x2f   :  { %224 = vmatpush2.msra.mxu0 %v129_v22  ;;  %v122_v28 = vld [vmem:[%s908_s4 + $0x2e8] sm:$0xff]  ;;  %290 = vmatprep.subr.mxu1 %v140_v23  ;;  %v135_v29 = vld [vmem:[%s908_s4 + $0x350] sm:$0xff]  ;;  %v121_v30 = vld [vmem:[%s908_s4 + $0x2e0] sm:$0xff]  ;;  %s374_s11 = sshll.u32 %s454_s10, 4  ;;  %s375_s11 = int_to_ptr.vmem [resolvable:$true] %s374_s11 }
  0x30   :  { %225 = vmatprep.subr.mxu0 %v126_v24  ;;  %291 = vmatpush2.msra.mxu1 %v139_v25  ;;  %v132_v31 = vld [vmem:[%s908_s4 + $0x338] sm:$0xff]  ;;  %v118_v32 = vld [vmem:[%s908_s4 + $0x2c8] sm:$0xff]  ;;  %v131_v33 = vld [vmem:[%s908_s4 + $0x330] sm:$0xff]  ;;  %v160_v5 = vshrl.u32 %v159_v4, 7  ;;  %s409_s12 = scalar_lea.vmem %s375_s11, 128  ;;  %p414_p1 = scmp.lt.s32.totalorder %s375_s11, %s375_s11 }
  0x31   :  { %226 = vmatpush2.msra.mxu0 %v125_v26  ;;  %292 = vmatprep.subr.mxu1 %v136_v27  ;;  %v117_v34 = vld [vmem:[%s908_s4 + $0x2c0] sm:$0xff]  ;;  %v128_v35 = vld [vmem:[%s908_s4 + $0x318] sm:$0xff]  ;;  %v114_v36 = vld [vmem:[%s908_s4 + $0x2a8] sm:$0xff]  ;;  %p410_p0 = scmp.ne.s32.totalorder %s375_s11, %s409_s12  ;;  %p415_p2 = scmp.lt.s32.totalorder %s409_s12, %s409_s12 }
  0x32   :  { %227 = vmatprep.subr.mxu0 %v122_v28  ;;  %293 = vmatpush2.msra.mxu1 %v135_v29  ;;  %v28_v37 = vld [vmem:[%s904_s0 + $0x8] sm:$0xff]  ;;  %v113_v38 = vld [vmem:[%s908_s4 + $0x2a0] sm:$0xff]  ;;  %v127_v39 = vld [vmem:[%s908_s4 + $0x310] sm:$0xff]  ;;  %v161_v6 = vsub.s32 0, %v160_v5  ;;  %v165_v8 = vsub.s32 1, %v160_v5  ;;  %v173_v16 = vsub.s32 3, %v160_v5 }
  0x33   :  { %228 = vmatpush2.msra.mxu0 %v121_v30  ;;  %294 = vmatprep.subr.mxu1 %v132_v31  ;;  %v110_v40 = vld [vmem:[%s908_s4 + $0x288] sm:$0xff]  ;;  %v124_v41 = vld [vmem:[%s908_s4 + $0x2f8] sm:$0xff]  ;;  %v109_v42 = vld [vmem:[%s908_s4 + $0x280] sm:$0xff]  ;;  %v169_v19 = vsub.s32 2, %v160_v5  ;;  %p416_p3 = por %p415_p2, %p414_p1 }
  0x34   :  { %229 = vmatprep.subr.mxu0 %v118_v32  ;;  %295 = vmatpush2.msra.mxu1 %v131_v33  ;;  %v123_v43 = vld [vmem:[%s908_s4 + $0x2f0] sm:$0xff]  ;;  %v106_v44 = vld [vmem:[%s908_s4 + $0x268] sm:$0xff]  ;;  %v120_v45 = vld [vmem:[%s908_s4 + $0x2d8] sm:$0xff] }
  0x35   :  { %230 = vmatpush2.msra.mxu0 %v117_v34  ;;  %296 = vmatprep.subr.mxu1 %v128_v35  ;;  %v105_v46 = vld [vmem:[%s908_s4 + $0x260] sm:$0xff]  ;;  %v119_v47 = vld [vmem:[%s908_s4 + $0x2d0] sm:$0xff]  ;;  %v102_v48 = vld [vmem:[%s908_s4 + $0x248] sm:$0xff]  ;;  %p417_p4 = pnand %p416_p3, %p410_p0 }
  0x36   :  { %231 = vmatprep.subr.mxu0 %v114_v36  ;;  %243 = vmatprep.mubr.f32.mxu0 %v28_v37  ;;  %v116_v49 = vld [vmem:[%s908_s4 + $0x2b8] sm:$0xff]  ;;  %v101_v50 = vld [vmem:[%s908_s4 + $0x240] sm:$0xff]  ;;  %v115_v51 = vld [vmem:[%s908_s4 + $0x2b0] sm:$0xff] }
  0x37   :  { %232 = vmatpush2.msra.mxu0 %v113_v38  ;;  %297 = vmatpush2.msra.mxu1 %v127_v39  ;;  %v98_v52 = vld [vmem:[%s908_s4 + $0x228] sm:$0xff]  ;;  %v112_v53 = vld [vmem:[%s908_s4 + $0x298] sm:$0xff]  ;;  %v97_v54 = vld [vmem:[%s908_s4 + $0x220] sm:$0xff] }
  0x38   :  { %233 = vmatprep.subr.mxu0 %v110_v40  ;;  %298 = vmatprep.subr.mxu1 %v124_v41  ;;  %v111_v55 = vld [vmem:[%s908_s4 + $0x290] sm:$0xff]  ;;  %v94_v56 = vld [vmem:[%s908_s4 + $0x208] sm:$0xff]  ;;  %v108_v57 = vld [vmem:[%s908_s4 + $0x278] sm:$0xff] }
  0x39   :  { %234 = vmatpush2.msra.mxu0 %v109_v42  ;;  %299 = vmatpush2.msra.mxu1 %v123_v43  ;;  %v93_v58 = vld [vmem:[%s908_s4 + $0x200] sm:$0xff]  ;;  %v107_v59 = vld [vmem:[%s908_s4 + $0x270] sm:$0xff]  ;;  %v104_v61 = vld [vmem:[%s908_s4 + $0x258] sm:$0xff] }
  0x3a   :  { %235 = vmatprep.subr.mxu0 %v106_v44  ;;  %300 = vmatprep.subr.mxu1 %v120_v45  ;;  %v27_v60 = vld [vmem:[%s904_s0] sm:$0xff]  ;;  %v103_v62 = vld [vmem:[%s908_s4 + $0x250] sm:$0xff]  ;;  %v100_v63 = vld [vmem:[%s908_s4 + $0x238] sm:$0xff] }
  0x3b   :  { %236 = vmatpush2.msra.mxu0 %v105_v46  ;;  %301 = vmatpush2.msra.mxu1 %v119_v47  ;;  %v345_v0 = vld [vmem:[%s907_s3] sm:$0xff]  ;;  %v99_v1 = vld [vmem:[%s908_s4 + $0x230] sm:$0xff]  ;;  %v96_v2 = vld [vmem:[%s908_s4 + $0x218] sm:$0xff] }
  0x3c   :  { %237 = vmatprep.subr.mxu0 %v102_v48  ;;  %302 = vmatprep.subr.mxu1 %v116_v49  ;;  %v95_v3 = vld [vmem:[%s908_s4 + $0x210] sm:$0xff]  ;;  %v157_v7 = vld [vmem:[%s909_s5] sm:$0xf] }
  0x3d   :  { %238 = vmatpush2.msra.mxu0 %v101_v50  ;;  %303 = vmatpush2.msra.mxu1 %v115_v51  ;;  %v162_v9 = vrot.slane %v157_v7, %v161_v6  ;;  %v166_v10 = vrot.slane %v157_v7, %v165_v8  ;;  %v174_v20 = vrot.slane %v157_v7, %v173_v16  ;;  %v341_v33 = vld [vmem:[%s906_s2] sm:$0xff] }
  0x3e   :  { %239 = vmatprep.subr.mxu0 %v98_v52  ;;  %304 = vmatprep.subr.mxu1 %v112_v53  ;;  %v170_v22 = vrot.slane %v157_v7, %v169_v19 }
  0x3f   :  { %240 = vmatpush2.msra.mxu0 %v97_v54  ;;  %305 = vmatpush2.msra.mxu1 %v111_v55 }
  0x40   :  { %241 = vmatprep.subr.mxu0 %v94_v56  ;;  %306 = vmatprep.subr.mxu1 %v108_v57 }
  0x41   :  { %242 = vmatpush2.msra.mxu0 %v93_v58  ;;  %307 = vmatpush2.msra.mxu1 %v107_v59 }
  0x42   :  { %244 = vmatmul.mubr.f32.vlgmr.msra.gmra.mxu0 %v27_v60  ;;  %308 = vmatprep.subr.mxu1 %v104_v61 }
  0x43   :  { %309 = vmatpush2.msra.mxu1 %v103_v62  ;;  %314 = vmatprep.mubr.f32.mxu1 %v28_v37 }
  0x44   :  { %310 = vmatprep.subr.mxu1 %v100_v63  ;;  %351 = vperm.xlu0 %392, %v345_v0  }
  0x45   :  { %311 = vmatpush2.msra.mxu1 %v99_v1 }
  0x46   :  { %312 = vmatprep.subr.mxu1 %v96_v2 }
  0x47   :  { %313 = vmatpush2.msra.mxu1 %v95_v3 }
  0x48   :  { %315 = vmatmul.mubr.f32.vlgmr.msra.gmra.mxu1 %v27_v60 }
 0x102   :  { %v245_v11 = vpop.f32.mrf.mxu0 }
 0x103   :  { %v246_v12 = vadd.f32 %v245_v11, %v162_v9 }
 0x104   :  { %v247_v13 = vpop.f32.mrf.mxu0 }
 0x105   :  { %v386_v14 = vmul.f32 -1.442695, %v246_v12  ;;  %v248_v15 = vadd.f32 %v247_v13, %v166_v10 }
 0x107   :  { %393 = vpow2.f32 %v386_v14  ;;  %v387_v17 = vmul.f32 -1.442695, %v248_v15 }
 0x108   :  { %v316_v18 = vpop.f32.mrf.mxu1 }
 0x109   :  { %395 = vpow2.f32 %v387_v17  ;;  %v317_v24 = vadd.f32 %v316_v18, %v170_v22 }
 0x10a   :  { %v318_v21 = vpop.f32.mrf.mxu1 }
 0x10b   :  { %v319_v23 = vadd.f32 %v318_v21, %v174_v20  ;;  %397 = vtanh.f32 %v317_v24 }
 0x10d   :  { %v388_v25 = vmul.f32 -1.442695, %v319_v23 }
 0x10f   :  { %399 = vpow2.f32 %v388_v25 }
 0x114   :  { %v394_v26 = vpop.eup %393 }
 0x115   :  { %v324_v27 = vadd.f32 1.0, %v394_v26 }
 0x116   :  { %v396_v28 = vpop.eup %395 }
 0x117   :  { %401 = vrcp.f32 %v324_v27  ;;  %v330_v29 = vadd.f32 1.0, %v396_v28 }
 0x118   :  { %v398_v30 = vpop.eup %397 }
 0x119   :  { %403 = vrcp.f32 %v330_v29 }
 0x11c   :  { %v400_v31 = vpop.eup %399 }
 0x11d   :  { %v337_v35 = vadd.f32 1.0, %v400_v31 }
 0x11f   :  { %405 = vrcp.f32 %v337_v35 }
 0x124   :  { %v402_v32 = vpop.eup %401 }
 0x125   :  { %v343_v37 = vmul.f32 %v402_v32, %v398_v30 }
 0x126   :  { %v404_v34 = vpop.eup %403 }
 0x127   :  { %v342_v36 = vmul.f32 %v404_v34, %v341_v33 }
 0x129   :  { %v344_v38 = vadd.f32 %v343_v37, %v342_v36 }
 0x12b   :  { %357 = vst [vmem:[#allocation4] sm:$0xff] %v344_v38  ;;  %407 = vtanh.f32 %v344_v38 }
 0x12c   :  { %420 = shalt.err (!%p417_p4)
}
 0x12d   :  { %377 = dma.vmem_to_hbm [thread:$0]  %s375_s11, 128, %s911_s7, [#allocation5]   ;;  %v406_v39 = vpop.eup %405  ;;  %v340_v41 = vld [vmem:[%s905_s1] sm:$0xff]  ;;  %v352_v43 = vpop.permute.xlu0 %351 }
 0x12e   :  { %s455_s16 = smov [#allocation2]  }
 0x12f   :  { %s364_s17 = sshll.u32 %s455_s16, 4  ;;  %s365_s17 = int_to_ptr.vmem [resolvable:$true] %s364_s17 }
 0x130   :  { %s429_s18 = scalar_lea.vmem %s365_s17, 128  ;;  %p434_p6 = scmp.lt.s32.totalorder %s365_s17, %s365_s17 }
 0x131   :  { %p430_p5 = scmp.ne.s32.totalorder %s365_s17, %s429_s18  ;;  %p435_p7 = scmp.lt.s32.totalorder %s429_s18, %s429_s18 }
 0x133   :  { %p436_p8 = por %p435_p7, %p434_p6 }
 0x135   :  { %p437_p9 = pnand %p436_p8, %p430_p5 }
 0x138   :  { %v408_v40 = vpop.eup %407 }
 0x139   :  { %v347_v42 = vmul.f32 %v408_v40, %v406_v39 }
 0x13b   :  { %v348_v44 = vsub.f32 %v347_v42, %v340_v41 }
 0x13d   :  { %v354_v45 = vmul.f32 %v352_v43, %v348_v44 }
 0x13f   :  { %v355_v46 = vadd.f32 %v354_v45, %v340_v41 }
 0x141   :  { %356 = vst [vmem:[#allocation2] sm:$0xff] %v355_v46 }
 0x142   :  { %440 = shalt.err (!%p437_p9)
}
 0x143   :  { %367 = dma.vmem_to_hbm [thread:$0]  %s365_s17, 128, %s910_s6, [#allocation3]  }
 0x144   :  { %449 = dma.done.wait [#allocation3], 128  }
 0x145   :  { %450 = vsyncadd [#allocation3], 4294967168 }
 0x146   :  { %451 = dma.done.wait [#allocation5], 128  }
 0x147   :  { %452 = vsyncadd [#allocation5], 4294967168 }
 0x148   :  { %384 = vsyncpa [#allocation3], 1 }
 0x149   :  { %385 = vsyncpa [#allocation5], 1 }

</bundles_post_ra>
